<compile_context>
chip_gen: v6e
topology: v6e:2x2x1
jax: 0.10.0
libtpu: 0.0.40
codegen_flags: <defaults>
</compile_context>

<pallas_src>
import jax
import jax.numpy as jnp
from jax.experimental import pallas as pl
from jax.experimental.pallas import tpu as pltpu


def _identity_alias_kernel(x_hbm_ref, o_hbm_ref):
    # The output buffer is aliased to the input buffer (input_output_aliases),
    # so the result is already in place.  Zero DMA, zero compute.
    pass


def _identity_dma_kernel(x_hbm_ref, o_hbm_ref, sem):
    # Materializing variant: one whole-array HBM->HBM DMA.  No VMEM round trip,
    # no tiling, no padding; the DMA engine saturates HBM bandwidth on its own.
    cp = pltpu.make_async_copy(x_hbm_ref, o_hbm_ref, sem)
    cp.start()
    cp.wait()


def pallas_identity(x):
    """Identity forward pass. Output buffer is aliased to the input buffer.

    Under `jax.jit(..., donate_argnums=0)` this is a true zero-copy identity;
    without donation the runtime inserts a single device-to-device copy.
    """
    if x.size == 0:
        return x  # zero-size edge case: nothing to do, avoid a degenerate call
    return pl.pallas_call(
        _identity_alias_kernel,
        out_shape=jax.ShapeDtypeStruct(x.shape, x.dtype),
        in_specs=[pl.BlockSpec(memory_space=pl.ANY)],
        out_specs=pl.BlockSpec(memory_space=pl.ANY),
        input_output_aliases={0: 0},
    )(x)


def pallas_identity_copy(x):
    """Identity that materializes a fresh buffer via a single HBM->HBM DMA."""
    if x.size == 0:
        return x
    return pl.pallas_call(
        _identity_dma_kernel,
        out_shape=jax.ShapeDtypeStruct(x.shape, x.dtype),
        in_specs=[pl.BlockSpec(memory_space=pl.ANY)],
        out_specs=pl.BlockSpec(memory_space=pl.ANY),
        scratch_shapes=[pltpu.SemaphoreType.DMA],
    )(x)


if __name__ == "__main__":
    key = jax.random.PRNGKey(0)
    k1, k2, k3 = jax.random.split(key, 3)

    # Primary example input (NCHW-like small shape).
    x = jax.random.normal(k1, (2, 4, 16, 16), jnp.float32)
    out = jax.block_until_ready(pallas_identity(x))
    assert out.shape == x.shape and out.dtype == x.dtype
    assert bool(jnp.all(out == x)), "identity (aliased) mismatch"

    # Materializing DMA-copy variant on the same input.
    out_c = jax.block_until_ready(pallas_identity_copy(x))
    assert out_c.shape == x.shape and out_c.dtype == x.dtype
    assert bool(jnp.all(out_c == x)), "identity (DMA copy) mismatch"

    # Ragged / non-(8,128)-aligned shape: no padding or slicing needed anymore.
    y = jax.random.normal(k2, (3, 5, 7), jnp.float32)
    out_y = jax.block_until_ready(pallas_identity(y))
    assert out_y.shape == y.shape
    assert bool(jnp.all(out_y == y)), "identity mismatch (ragged shape)"
    out_yc = jax.block_until_ready(pallas_identity_copy(y))
    assert bool(jnp.all(out_yc == y)), "identity DMA copy mismatch (ragged shape)"

    # Zero-size edge case flagged in the review.
    e = jnp.zeros((0, 4), jnp.float32)
    assert pallas_identity(e).shape == (0, 4)

    # True zero-copy path: donated input under jit -> output aliases the
    # original HBM buffer, ~zero HBM traffic.
    identity_donated = jax.jit(pallas_identity, donate_argnums=0)
    z = jax.random.normal(k3, (2, 4, 16, 16), jnp.float32)
    z_ref = z + 0.0  # independent buffer holding the same values
    out_z = jax.block_until_ready(identity_donated(z))  # z is donated here
    assert out_z.shape == z_ref.shape and out_z.dtype == z_ref.dtype
    assert bool(jnp.all(out_z == z_ref)), "identity mismatch (donated path)"

    print("KERNEL_OK")
</pallas_src>

<mosaic_0001>
module attributes {stable_mosaic.version = 11 : i64} {
  func.func @_identity_alias_kernel(%arg0: memref<2x4x16x16xf32, #tpu.memory_space<any>>, %arg1: memref<2x4x16x16xf32, #tpu.memory_space<any>>) attributes {dimension_semantics = [], scalar_prefetch = 0 : i64, scratch_operands = 0 : i64, tpu.core_type = #tpu.core_type<tc>} {
    return
  }
}

</mosaic_0001>

<bundles_post_ra>
// kernel: tpu_custom_call.1
= control target key start
LH: loop header
LB: loop body
LE: loop exit
PB: predicated region body
PF: predicated region fallthrough
CT: control target
= control target key end

     0   :  { %s16_s0 = inlined_call_operand.hbm [shape: f32[2,4,16,16], index: 0, kind: input, shape index: {}, may-alias: {0,1}]   ;;  %s17_s1 = inlined_call_operand.hbm [shape: f32[2,4,16,16], index: 1, kind: output, shape index: {}, may-alias: {0,1}]  }

</bundles_post_ra>
